<compile_context>
chip_gen: v7x
topology: tpu7x:2x2x1
jax: 0.10.0
libtpu: 0.0.40
codegen_flags: <defaults>
</compile_context>

<pallas_src>
import jax
import jax.numpy as jnp
from jax.experimental import pallas as pl
from jax.experimental.pallas import tpu as pltpu


_LANE = 128          # TPU vreg lane width
_SUBLANE = 8         # TPU vreg sublane count
_ROW_ALIGN = 16      # row-tile alignment (bf16 sublane packing friendly)
_MAX_ROW_TILE = 4096 # cap on rows per tile


def _round_up(v, m):
    return (v + m - 1) // m * m


def _vmem_capacity_bytes():
    """Per-core VMEM capacity; conservative fallback if the query fails."""
    try:
        info = pltpu.get_tpu_info()
        cap = getattr(info, "vmem_capacity_bytes", None)
        if cap:
            return int(cap)
    except Exception:
        pass
    return 64 * 1024 * 1024  # v7x per-TC VMEM (smallest of v5e/v6e/v7x)


def _make_soft_ce_kernel(n_rows, row_tile):
    """Kernel closure over the true row count (for ragged-last-tile masking)."""

    def kernel(x_ref, t_ref, out_ref):
        x = x_ref[...].astype(jnp.float32)
        t = t_ref[...].astype(jnp.float32)

        # Valid-row mask for the (possibly ragged) last tile. Rows >= n_rows
        # hold undefined data and must not contribute to the sum.
        tile_start = pl.program_id(0) * row_tile
        row_ids = tile_start + jax.lax.broadcasted_iota(
            jnp.int32, (row_tile, 1), 0)
        valid = row_ids < n_rows                         # (row_tile, 1)

        # Numerically-stable pieces of log_softmax along the class axis.
        m = jnp.max(x, axis=-1, keepdims=True)           # (row_tile, 1)
        shifted = x - m
        lse = jnp.log(jnp.sum(jnp.exp(shifted), axis=-1, keepdims=True))

        # sum_c(-t * (shifted - lse)) == lse * sum_c(t) - sum_c(t * shifted)
        t_sum = jnp.sum(t, axis=-1, keepdims=True)
        ts_sum = jnp.sum(t * shifted, axis=-1, keepdims=True)
        row_loss = lse * t_sum - ts_sum                  # (row_tile, 1)

        # Zero out padded rows (select, so NaN/inf in garbage rows is safe).
        row_loss = jnp.where(valid, row_loss, 0.0)
        tile_sum = jnp.sum(row_loss)                     # scalar partial sum

        # Lane-dense, unmasked (1, 8, 128) store of this tile's partial sum.
        out_ref[...] = jnp.broadcast_to(
            tile_sum, out_ref.shape).astype(out_ref.dtype)

    return kernel


def soft_target_cross_entropy(x, target):
    assert x.shape == target.shape, "x and target must have the same shape"
    c = x.shape[-1]
    x2 = x.reshape(-1, c)
    t2 = target.reshape(-1, c)
    n = x2.shape[0]

    # --- generation-aware VMEM budgets -------------------------------------
    vmem_cap = _vmem_capacity_bytes()
    vmem_limit_bytes = min(int(0.6 * vmem_cap), 100 * 1024 * 1024)
    tile_byte_budget = int(0.35 * vmem_cap)

    # --- pick the largest row tile that fits the budget --------------------
    # 2 pipeline buffers per input (at the input's own itemsize) plus ~6
    # tile-sized f32 intermediates inside the kernel body.
    per_row_bytes = (2 * (x2.dtype.itemsize + t2.dtype.itemsize) * c
                     + 6 * 4 * c)
    row_tile = tile_byte_budget // max(per_row_bytes, 1)
    row_tile = max(_ROW_ALIGN,
                   min(_MAX_ROW_TILE, (row_tile // _ROW_ALIGN) * _ROW_ALIGN))
    row_tile = min(row_tile, _round_up(n, _ROW_ALIGN))

    num_tiles = pl.cdiv(n, row_tile)

    partials = pl.pallas_call(
        _make_soft_ce_kernel(n, row_tile),
        out_shape=jax.ShapeDtypeStruct((num_tiles, _SUBLANE, _LANE),
                                       jnp.float32),
        grid_spec=pltpu.PrefetchScalarGridSpec(
            num_scalar_prefetch=0,
            grid=(num_tiles,),
            in_specs=[
                # Full class extent (no host-side padding even if C % 128 != 0).
                pl.BlockSpec((row_tile, c), lambda i: (i, 0)),
                pl.BlockSpec((row_tile, c), lambda i: (i, 0)),
            ],
            out_specs=pl.BlockSpec((1, _SUBLANE, _LANE), lambda i: (i, 0, 0)),
        ),
        compiler_params=pltpu.CompilerParams(
            dimension_semantics=("parallel",),   # each tile owns its out block
            vmem_limit_bytes=vmem_limit_bytes,
        ),
    )(x2, t2)

    # Per-tile partial sums -> scalar mean over the original row count.
    total = jnp.sum(partials[:, 0, 0])
    return (total / n).astype(x.dtype)


def _reference(x, target):
    logp = jax.nn.log_softmax(x.astype(jnp.float32), axis=-1)
    loss = jnp.sum(-target.astype(jnp.float32) * logp, axis=-1)
    return loss.mean()


if __name__ == "__main__":
    key = jax.random.PRNGKey(0)

    # Case 1: ragged everywhere — 3*5 = 15 rows (not a multiple of 8),
    # 37 classes (not a multiple of 128). Exercises the in-kernel row mask
    # and the non-lane-aligned class extent.
    k1, k2, k3, k4 = jax.random.split(key, 4)
    x1 = jax.random.normal(k1, (3, 5, 37), dtype=jnp.float32)
    t1 = jax.nn.softmax(jax.random.normal(k2, (3, 5, 37), dtype=jnp.float32),
                        axis=-1)
    out1 = jax.block_until_ready(soft_target_cross_entropy(x1, t1))
    ref1 = _reference(x1, t1)
    assert jnp.allclose(out1, ref1, rtol=1e-5, atol=1e-5), (out1, ref1)

    # Case 2: aligned path — 16 rows, 256 classes.
    x2 = jax.random.normal(k3, (16, 256), dtype=jnp.float32)
    t2 = jax.nn.softmax(jax.random.normal(k4, (16, 256), dtype=jnp.float32),
                        axis=-1)
    out2 = jax.block_until_ready(soft_target_cross_entropy(x2, t2))
    ref2 = _reference(x2, t2)
    assert jnp.allclose(out2, ref2, rtol=1e-5, atol=1e-5), (out2, ref2)

    print("KERNEL_OK")
</pallas_src>

<mosaic_0001>
module attributes {stable_mosaic.version = 11 : i64} {
  func.func @kernel(%arg0: i32, %arg1: memref<16x37xf32, #tpu.memory_space<vmem>>, %arg2: memref<16x37xf32, #tpu.memory_space<vmem>>, %arg3: memref<1x8x128xf32, #tpu.memory_space<vmem>>) attributes {dimension_semantics = [#tpu.dimension_semantics<parallel>], iteration_bounds = array<i64: 1>, scalar_prefetch = 0 : i64, scratch_operands = 0 : i64, tpu.core_type = #tpu.core_type<tc>, window_params = [{transform_indices = @transform_0, window_bounds = array<i64: 16, 37>}, {transform_indices = @transform_1, window_bounds = array<i64: 16, 37>}, {transform_indices = @transform_2, window_bounds = array<i64: 1, 8, 128>}]} {
    %c0 = arith.constant 0 : index
    %c0_0 = arith.constant 0 : index
    %0 = vector.load %arg1[%c0, %c0_0] : memref<16x37xf32, #tpu.memory_space<vmem>>, vector<16x37xf32>
    %c0_1 = arith.constant 0 : index
    %c0_2 = arith.constant 0 : index
    %1 = vector.load %arg2[%c0_1, %c0_2] : memref<16x37xf32, #tpu.memory_space<vmem>>, vector<16x37xf32>
    %c16_i32 = arith.constant 16 : i32
    %2 = arith.muli %arg0, %c16_i32 : i32
    %3 = tpu.iota {dimensions = array<i32: 0>} : vector<16x1xi32>
    %4 = vector.broadcast %2 : i32 to vector<16x1xi32>
    %5 = arith.addi %4, %3 : vector<16x1xi32>
    %c15_i32 = arith.constant 15 : i32
    %6 = vector.broadcast %c15_i32 : i32 to vector<16x1xi32>
    %7 = arith.cmpi slt, %5, %6 : vector<16x1xi32>
    %cst = arith.constant dense<0xFF800000> : vector<16xf32>
    %8 = vector.multi_reduction <maximumf>, %0, %cst [1] : vector<16x37xf32> to vector<16xf32>
    %9 = vector.shape_cast %8 : vector<16xf32> to vector<16x1xf32>
    %10 = vector.broadcast %9 : vector<16x1xf32> to vector<16x37xf32>
    %11 = arith.subf %0, %10 : vector<16x37xf32>
    %12 = math.exp %11 : vector<16x37xf32>
    %cst_3 = arith.constant dense<0.000000e+00> : vector<16xf32>
    %13 = vector.multi_reduction <add>, %12, %cst_3 [1] : vector<16x37xf32> to vector<16xf32>
    %14 = vector.shape_cast %13 : vector<16xf32> to vector<16x1xf32>
    %15 = math.log %14 : vector<16x1xf32>
    %cst_4 = arith.constant dense<0.000000e+00> : vector<16xf32>
    %16 = vector.multi_reduction <add>, %1, %cst_4 [1] : vector<16x37xf32> to vector<16xf32>
    %17 = vector.shape_cast %16 : vector<16xf32> to vector<16x1xf32>
    %18 = arith.mulf %1, %11 : vector<16x37xf32>
    %cst_5 = arith.constant dense<0.000000e+00> : vector<16xf32>
    %19 = vector.multi_reduction <add>, %18, %cst_5 [1] : vector<16x37xf32> to vector<16xf32>
    %20 = vector.shape_cast %19 : vector<16xf32> to vector<16x1xf32>
    %21 = arith.mulf %15, %17 : vector<16x1xf32>
    %22 = arith.subf %21, %20 : vector<16x1xf32>
    %cst_6 = arith.constant 0.000000e+00 : f32
    %23 = vector.broadcast %cst_6 : f32 to vector<16x1xf32>
    %24 = arith.select %7, %22, %23 : vector<16x1xi1>, vector<16x1xf32>
    %25 = vector.shape_cast %24 : vector<16x1xf32> to vector<1x16x1xf32>
    %cst_7 = arith.constant dense<0.000000e+00> : vector<1xf32>
    %26 = vector.multi_reduction <add>, %25, %cst_7 [1, 2] : vector<1x16x1xf32> to vector<1xf32>
    %27 = vector.shape_cast %26 : vector<1xf32> to vector<1x1x1xf32>
    %28 = vector.extract %27[0, 0, 0] : f32 from vector<1x1x1xf32>
    %29 = vector.broadcast %28 : f32 to vector<1x8x128xf32>
    %c0_8 = arith.constant 0 : index
    %c0_9 = arith.constant 0 : index
    %c0_10 = arith.constant 0 : index
    %30 = vector.load %arg3[%c0_8, %c0_9, %c0_10] : memref<1x8x128xf32, #tpu.memory_space<vmem>>, vector<1x8x128xf32>
    tpu.vector_store %arg3[%c0_8, %c0_9, %c0_10], %29 {strides = array<i32>} : memref<1x8x128xf32, #tpu.memory_space<vmem>>, vector<1x8x128xf32>,
    return
  }
  func.func @transform_0(%arg0: i32) -> (i32, i32) {
    %c0_i32 = arith.constant 0 : i32
    %c0_i32_0 = arith.constant 0 : i32
    return %arg0, %c0_i32 : i32, i32
  }
  func.func @transform_1(%arg0: i32) -> (i32, i32) {
    %c0_i32 = arith.constant 0 : i32
    %c0_i32_0 = arith.constant 0 : i32
    return %arg0, %c0_i32 : i32, i32
  }
  func.func @transform_2(%arg0: i32) -> (i32, i32, i32) {
    %c0_i32 = arith.constant 0 : i32
    %c0_i32_0 = arith.constant 0 : i32
    %c0_i32_1 = arith.constant 0 : i32
    return %arg0, %c0_i32, %c0_i32_0 : i32, i32, i32
  }
}

</mosaic_0001>

<bundles_post_ra>
// kernel: tpu_custom_call.1
= control target key start
LH: loop header
LB: loop body
LE: loop exit
PB: predicated region body
PF: predicated region fallthrough
CT: control target
= control target key end

     0   :  { %7 = vsyncpa [#allocation3], 0  ;;  %s278_s0 = inlined_call_operand.hbm [shape: f32[15,37], index: 0, kind: input, shape index: {}]   ;;  %s279_s1 = inlined_call_operand.hbm [shape: f32[15,37], index: 1, kind: input, shape index: {}]   ;;  %s280_s2 = inlined_call_operand.hbm [shape: f32[1,8,128], index: 2, kind: output, shape index: {}]  }
   0x1   :  { %8 = vsyncpa [#allocation6], 0 }
   0x2   :  { %9 = vsyncpa [#allocation4], 0  ;;  %s214_s9 = smov [#allocation2]   ;;  %s142_s13 = scalar_lea.hbm %s278_s0, 256 }
   0x3   :  { %s15_s10 = sshll.u32 %s214_s9, 4  ;;  %p143_p0 = scmp.ne.s32.totalorder %s278_s0, %s142_s13  ;;  %s16_s10 = int_to_ptr.vmem [resolvable:$true] %s15_s10 }
   0x4   :  { %p146_p1 = scmp.lt.u32.totalorder %s142_s13, %s278_s0 }
   0x6   :  { %p148_p2 = pnand %p146_p1, %p143_p0 }
   0x8   :  { %151 = shalt.err (!%p148_p2)
}
   0x9   :  { %s152_s18 = scalar_lea.vmem %s16_s10, 256  ;;  %p157_p4 = scmp.lt.s32.totalorder %s16_s10, %s16_s10 }
   0xa   :  { %p153_p3 = scmp.ne.s32.totalorder %s16_s10, %s152_s18  ;;  %p158_p5 = scmp.lt.s32.totalorder %s152_s18, %s152_s18 }
   0xc   :  { %p159_p6 = por %p158_p5, %p157_p4 }
   0xe   :  { %p160_p7 = pnand %p159_p6, %p153_p3 }
  0x10   :  { %163 = shalt.err (!%p160_p7)
}
  0x11   :  { %s215_s19 = smov 128   ;;  %s216_s20 = smov 8  }
  0x12   :  { %21 = dma.hbm_to_vmem [thread:$0]  %s278_s0, 256, %s16_s10, [#allocation3], %s215_s19, %s215_s19, %s216_s20  }
  0x13   :  { %s217_s23 = smov [#allocation5]   ;;  %s164_s27 = scalar_lea.hbm %s279_s1, 256 }
  0x14   :  { %s27_s24 = sshll.u32 %s217_s23, 4  ;;  %p165_p8 = scmp.ne.s32.totalorder %s279_s1, %s164_s27  ;;  %s28_s24 = int_to_ptr.vmem [resolvable:$true] %s27_s24 }
  0x15   :  { %p168_p9 = scmp.lt.u32.totalorder %s164_s27, %s279_s1 }
  0x17   :  { %p170_p10 = pnand %p168_p9, %p165_p8 }
  0x19   :  { %173 = shalt.err (!%p170_p10)
}
  0x1a   :  { %s174_s4 = scalar_lea.vmem %s28_s24, 256  ;;  %p179_p12 = scmp.lt.s32.totalorder %s28_s24, %s28_s24 }
  0x1b   :  { %p175_p11 = scmp.ne.s32.totalorder %s28_s24, %s174_s4  ;;  %p180_p13 = scmp.lt.s32.totalorder %s174_s4, %s174_s4 }
  0x1d   :  { %p181_p0 = por %p180_p13, %p179_p12 }
  0x1f   :  { %p182_p1 = pnand %p181_p0, %p175_p11 }
  0x21   :  { %185 = shalt.err (!%p182_p1)
}
  0x22   :  { %33 = dma.hbm_to_vmem [thread:$0]  %s279_s1, 256, %s28_s24, [#allocation6], %s215_s19, %s215_s19, %s216_s20  }
  0x23   :  { %208 = dma.done.wait [#allocation3], 256  }
  0x24   :  { %209 = vsyncadd [#allocation3], 4294967040 }
  0x25   :  { %210 = dma.done.wait [#allocation6], 256  }
  0x26   :  { %211 = vsyncadd [#allocation6], 4294967040  ;;  %vm53_vm0 = vcmask 302080   ;;  %v41_v0 = vld [vmem:[#allocation2 + $0x8] sm:$0xff]  ;;  %v40_v1 = vld [vmem:[#allocation2] sm:$0xff]  ;;  %v45_v24 = vlaneseq  ;;  %vm96_vm2 = vcmask 7168  }
  0x27   :  { %v57_v2 = vsel %vm53_vm0, %v41_v0, -inf  ;;  %v54_v3 = vsel %vm53_vm0, %v40_v1, -inf  ;;  %v43_v4 = vld [vmem:[#allocation5 + $0x8] sm:$0xff]  ;;  %v42_v18 = vld [vmem:[#allocation5] sm:$0xff]  ;;  %s218_s1 = smov [#allocation7]  }
  0x28   :  { %58 = vmax.xlane.f32.xlu0 %v57_v2  ;;  %v79_v5 = vsel %vm53_vm0, %v43_v4, 0.0  ;;  %v76_v19 = vsel %vm53_vm0, %v42_v18, 0.0  ;;  %v46_v25 = vshrl.u32 %v45_v24, 7  ;;  %s117_s6 = sshll.u32 %s218_s1, 4  ;;  %s118_s6 = int_to_ptr.vmem [resolvable:$true] %s117_s6 }
  0x29   :  { %s186_s8 = scalar_lea.vmem %s118_s6, 128  ;;  %p191_p3 = scmp.lt.s32.totalorder %s118_s6, %s118_s6 }
  0x2a   :  { %v47_v29 = vadd.s32 8, %v46_v25  ;;  %p187_p2 = scmp.ne.s32.totalorder %s118_s6, %s186_s8  ;;  %p192_p4 = scmp.lt.s32.totalorder %s186_s8, %s186_s8 }
  0x2c   :  { %55 = vmax.xlane.f32.xlu0 %v54_v3  ;;  %vm52_vm1 = vcmp.lt.s32.totalorder %v47_v29, 15  ;;  %p193_p5 = por %p192_p4, %p191_p3 }
  0x2e   :  { %p194_p6 = pnand %p193_p5, %p187_p2 }
  0x30   :  { %80 = vadd.xlane.f32.xlu0 %v79_v5 }
  0xb5   :  { %v59_v6 = vpop.xlane.xlu0 %58 }
  0xb6   :  { %v61_v7 = vsub.f32 %v41_v0, %v59_v6 }
  0xb8   :  { %v64_v8 = vmul.f32 1.442695, %v61_v7  ;;  %v83_v9 = vmul.f32 %v61_v7, %v43_v4 }
  0xb9   :  { %v56_v10 = vpop.xlane.xlu0 %55 }
  0xba   :  { %134 = vpow2.f32 %v64_v8  ;;  %v60_v11 = vsub.f32 %v40_v1, %v56_v10  ;;  %v87_v12 = vsel %vm53_vm0, %v83_v9, 0.0 }
  0xbb   :  { %88 = vadd.xlane.f32.xlu0 %v87_v12 }
  0xbc   :  { %v62_v13 = vmul.f32 1.442695, %v60_v11  ;;  %v82_v20 = vmul.f32 %v60_v11, %v42_v18 }
  0xbd   :  { %v81_v26 = vpop.xlane.xlu0 %80 }
  0xbe   :  { %136 = vpow2.f32 %v62_v13  ;;  %v84_v21 = vsel %vm53_vm0, %v82_v20, 0.0 }
  0xc4   :  { %v135_v14 = vpop.eup %134 }
  0xc5   :  { %v69_v15 = vsel %vm53_vm0, %v135_v14, 0.0 }
  0xc6   :  { %70 = vadd.xlane.f32.xlu1 %v69_v15 }
  0xc8   :  { %v137_v16 = vpop.eup %136 }
  0xc9   :  { %v66_v17 = vsel %vm53_vm0, %v137_v16, 0.0 }
  0xca   :  { %67 = vadd.xlane.f32.xlu1 %v66_v17 }
  0xce   :  { %77 = vadd.xlane.f32.xlu1 %v76_v19 }
  0xd2   :  { %85 = vadd.xlane.f32.xlu1 %v84_v21 }
 0x148   :  { %v89_v33 = vpop.xlane.xlu0 %88 }
 0x153   :  { %v71_v22 = vpop.xlane.xlu1 %70 }
 0x154   :  { %138 = vlog2.f32 %v71_v22 }
 0x157   :  { %v68_v23 = vpop.xlane.xlu1 %67 }
 0x158   :  { %140 = vlog2.f32 %v68_v23 }
 0x15b   :  { %v78_v30 = vpop.xlane.xlu1 %77 }
 0x15e   :  { %v139_v27 = vpop.eup %138 }
 0x15f   :  { %v75_v28 = vmul.f32 0.6931472, %v139_v27  ;;  %v86_v37 = vpop.xlane.xlu1 %85 }
 0x161   :  { %v91_v31 = vmul.f32 %v81_v26, %v75_v28 }
 0x162   :  { %v141_v32 = vpop.eup %140 }
 0x163   :  { %v73_v34 = vmul.f32 0.6931472, %v141_v32  ;;  %v93_v35 = vsub.f32 %v91_v31, %v89_v33 }
 0x165   :  { %v90_v36 = vmul.f32 %v78_v30, %v73_v34  ;;  %v95_v38 = vsel %vm52_vm1, %v93_v35, 0.0 }
 0x166   :  { %v98_v41 = vsel %vm96_vm2, %v95_v38, 0.0 }
 0x167   :  { %v92_v39 = vsub.f32 %v90_v36, %v86_v37 }
 0x169   :  { %v97_v40 = vsel %vm96_vm2, %v92_v39, 0.0 }
 0x16a   :  { %v99_v42 = vadd.f32 %v98_v41, %v97_v40 }
 0x16c   :  { %100 = vadd.xlane.f32.xlu0 %v99_v42 }
 0x1f9   :  { %v101_v43 = vpop.xlane.xlu0 %100 }
 0x1fa   :  { %v102_v44 = vrot.slane %v101_v43, 4 }
 0x1fc   :  { %v103_v45 = vadd.f32 %v102_v44, %v101_v43 }
 0x1fe   :  { %v104_v46 = vrot.slane %v103_v45, 2 }
 0x200   :  { %v105_v47 = vadd.f32 %v104_v46, %v103_v45 }
 0x202   :  { %v106_v48 = vrot.slane %v105_v47, 1 }
 0x204   :  { %v107_v49 = vadd.f32 %v106_v48, %v105_v47 }
 0x206   :  { %127 = vpush %v107_v49 }
 0x237   :  { %s128_s7 = spop %127 }
 0x238   :  { %v109_v50 = vstv %s128_s7 }
 0x239   :  { %110 = vst [vmem:[#allocation7] sm:$0xff] %v109_v50 }
 0x23a   :  { %197 = shalt.err (!%p194_p6)
}
 0x23b   :  { %s198_s11 = scalar_lea.hbm %s280_s2, 128 }
 0x23c   :  { %p199_p7 = scmp.ne.s32.totalorder %s280_s2, %s198_s11  ;;  %p202_p8 = scmp.lt.u32.totalorder %s198_s11, %s280_s2 }
 0x23e   :  { %p204_p9 = pnand %p202_p8, %p199_p7 }
 0x240   :  { %207 = shalt.err (!%p204_p9)
}
 0x241   :  { %120 = dma.vmem_to_hbm [thread:$0]  %s118_s6, 128, %s280_s2, [#allocation4]  }
 0x242   :  { %212 = dma.done.wait [#allocation4], 128  }
 0x243   :  { %213 = vsyncadd [#allocation4], 4294967168 }
 0x244   :  { %124 = vsyncpa [#allocation3], 1 }
 0x245   :  { %125 = vsyncpa [#allocation6], 1 }
 0x246   :  { %126 = vsyncpa [#allocation4], 1 }

</bundles_post_ra>
